<compile_context>
chip_gen: v6e
topology: v6e:2x2x1
jax: 0.10.0
libtpu: 0.0.40
codegen_flags: <defaults>
</compile_context>

<pallas_src>
import jax
import jax.numpy as jnp
from jax.experimental import pallas as pl
from jax.experimental.pallas import tpu as pltpu


# ----------------------------------------------------------------------------
# Generation-aware sizing.
# ----------------------------------------------------------------------------
def _query_vmem_capacity():
    try:
        info = pltpu.get_tpu_info()
        cap = getattr(info, "vmem_capacity_bytes", None)
        if cap:
            return int(cap)
    except Exception:
        pass
    return None


_VMEM_CAP = _query_vmem_capacity()
if _VMEM_CAP is not None and _VMEM_CAP >= (100 << 20):
    # v5e / v6e: 128 MiB physical VMEM -> larger tiles, explicitly raised scoped limit.
    _TILE_BYTES = 4 << 20
    _VMEM_LIMIT = 64 << 20
    _FUSED_MAX_BYTES = 16 << 20
else:
    # v7x (64 MiB physical) or unknown chip: conservative defaults fit the scoped limits.
    _TILE_BYTES = 2 << 20
    _VMEM_LIMIT = None
    _FUSED_MAX_BYTES = 6 << 20

_LANE_CHOICES = (1024, 512, 256, 128)
_N_SHARDS = 2          # reduction shards (lets both v7x TensorCores work; harmless elsewhere)


def _cparams(dims=None):
    kwargs = {}
    if dims is not None:
        kwargs["dimension_semantics"] = dims
    if _VMEM_LIMIT is not None:
        kwargs["vmem_limit_bytes"] = _VMEM_LIMIT
    return pltpu.CompilerParams(**kwargs)


def _sublane(dtype):
    # sublane packing granularity: 8 for 4-byte, 16 for 2-byte, 32 for 1-byte dtypes
    return max(8, 32 // jnp.dtype(dtype).itemsize)


# ----------------------------------------------------------------------------
# Quantization parameter containers (straight port of the torch classes).
# ----------------------------------------------------------------------------
class QuantizationParams:
    def __init__(self, q_type):
        self.q_type = q_type


class SignedFixedQuantizationParams(QuantizationParams):
    def __init__(self, bit_width, int_bit_width, q_type):
        super().__init__(q_type)
        self.bit_width = bit_width
        self.int_bit_width = int_bit_width
        self.frac_bit_width = self.bit_width - self.int_bit_width
        self.prescale = 2 ** self.frac_bit_width
        self.postscale = 2 ** (-self.frac_bit_width)
        self.min_val = -(2 ** (self.int_bit_width - 1))
        self.max_val = -self.min_val - self.postscale


class UnsignedFixedQuantizationParams(QuantizationParams):
    def __init__(self, bit_width, int_bit_width, q_type):
        super().__init__(q_type)
        self.bit_width = bit_width
        self.int_bit_width = int_bit_width
        self.frac_bit_width = self.bit_width - self.int_bit_width
        self.prescale = 2 ** self.frac_bit_width
        self.postscale = 2 ** (-self.frac_bit_width)
        self.min_val = 0.0
        self.max_val = 2 ** self.int_bit_width - self.postscale


# ----------------------------------------------------------------------------
# Layout helpers: flatten any tensor into a lane-dense (rows, lane) slab.
# Zero extra HBM traffic when x.size is a multiple of 128 (pure reshape);
# otherwise the flat vector is padded by < 128 elements.
# ----------------------------------------------------------------------------
def _to_slab(x):
    total = int(x.size)
    lane = next((l for l in _LANE_CHOICES if total >= l and total % l == 0), None)
    flat = x.reshape(-1)
    if lane is None:
        lane = 128
        pad = (-total) % lane
        if pad:
            flat = jnp.pad(flat, (0, pad))
    rows = flat.shape[0] // lane
    return flat.reshape(rows, lane), rows, lane, total


def _from_slab(out2d, shape, total):
    if out2d.size == total:
        return out2d.reshape(shape)
    return out2d.reshape(-1)[:total].reshape(shape)


def _tile_rows(rows, lane, dtype):
    sub = _sublane(dtype)
    target = max(sub, _TILE_BYTES // (lane * 4))
    return max(sub, (target // sub) * sub)


# ----------------------------------------------------------------------------
# Kernel 1: fixed-point quantize (signed or unsigned) — tiled elementwise.
# round-to-nearest with ties toward zero == the torch round() + floor/ceil tie override.
# ----------------------------------------------------------------------------
def _make_fixed_quant_kernel(prescale, postscale, min_val, max_val):
    prescale = float(prescale)
    postscale = float(postscale)
    min_val = float(min_val)
    max_val = float(max_val)

    def kernel(x_ref, o_ref):
        x = x_ref[...].astype(jnp.float32)
        q = x * prescale
        # Round-half-toward-zero, nearest otherwise.  Exact also for q ~= n + 0.5 - ulp
        # where floor(q + 0.5) would incorrectly round up (correctness-review fix).
        r = jnp.where(q >= 0.0, jnp.ceil(q - 0.5), jnp.floor(q + 0.5))
        o_ref[...] = jnp.clip(r * postscale, min_val, max_val).astype(o_ref.dtype)

    return kernel


def _fixed_quant(x, q_params):
    x2d, rows, lane, total = _to_slab(x)
    tile_r = _tile_rows(rows, lane, x.dtype)
    kernel = _make_fixed_quant_kernel(q_params.prescale, q_params.postscale,
                                      q_params.min_val, q_params.max_val)
    out_shape = jax.ShapeDtypeStruct((rows, lane), x.dtype)
    if rows <= tile_r:
        # Small-weight fast path: one resident block, no grid/pipeline machinery.
        out2d = pl.pallas_call(kernel, out_shape=out_shape,
                               compiler_params=_cparams())(x2d)
    else:
        out2d = pl.pallas_call(
            kernel,
            out_shape=out_shape,
            grid=(pl.cdiv(rows, tile_r),),   # ragged last block: OOB writes are masked
            in_specs=[pl.BlockSpec((tile_r, lane), lambda i: (i, 0))],
            out_specs=pl.BlockSpec((tile_r, lane), lambda i: (i, 0)),
            compiler_params=_cparams(("parallel",)),
        )(x2d)
    return _from_slab(out2d, x.shape, total)


# ----------------------------------------------------------------------------
# Binary scheme, >2-D weights: layer-wise scale = mean(|x|), out = scale * sign(x).
# ----------------------------------------------------------------------------
def _make_binary_fused_kernel(total):
    inv_total = 1.0 / float(total)

    def kernel(x_ref, o_ref):
        x = x_ref[...].astype(jnp.float32)
        scale = jnp.sum(jnp.abs(x)) * inv_total       # padded tail is zeros -> contributes 0
        sgn = jnp.where(x > 0.0, 1.0, jnp.where(x < 0.0, -1.0, 0.0))
        o_ref[...] = (scale * sgn).astype(o_ref.dtype)

    return kernel


def _binary_layerwise_fused(x):
    x2d, rows, lane, total = _to_slab(x)
    out2d = pl.pallas_call(
        _make_binary_fused_kernel(total),
        out_shape=jax.ShapeDtypeStruct((rows, lane), x.dtype),
        compiler_params=_cparams(),
    )(x2d)
    return _from_slab(out2d, x.shape, total)


def _make_abs_sum_kernel(rows, lane, tile_r, steps, need_mask):
    def kernel(x_ref, part_ref):
        i = pl.program_id(1)

        @pl.when(i == 0)
        def _init():
            part_ref[...] = jnp.zeros_like(part_ref)

        a = jnp.abs(x_ref[...].astype(jnp.float32))
        if need_mask:
            # Zero the ragged tail rows of the last real block and entire ghost blocks
            # (their DMAs are clamped in-bounds by the index_map; the mask removes them).
            row0 = (pl.program_id(0) * steps + i) * tile_r
            local = jax.lax.broadcasted_iota(jnp.int32, (tile_r, lane), 0)
            a = jnp.where(row0 + local < rows, a, 0.0)
        # Fold sublane-tile groups -> (8, lane): pure vreg adds, 32 KiB resident accumulator
        # living in the output block itself (no scratch).
        part_ref[...] += jnp.sum(a.reshape(tile_r // 8, 8, lane), axis=0)

    return kernel


def _make_scale_sign_kernel(total):
    inv_total = 1.0 / float(total)

    def kernel(part_ref, x_ref, o_ref):
        scale = jnp.sum(part_ref[...]) * inv_total    # partials block is grid-resident
        x = x_ref[...].astype(jnp.float32)
        sgn = jnp.where(x > 0.0, 1.0, jnp.where(x < 0.0, -1.0, 0.0))
        o_ref[...] = (scale * sgn).astype(o_ref.dtype)

    return kernel


def _binary_layerwise_two_pass(x):
    x2d, rows, lane, total = _to_slab(x)
    tile_r = _tile_rows(rows, lane, x.dtype)
    if rows <= tile_r:
        # Tiny input: the fused single-pass kernel is both simpler and faster.
        return _binary_layerwise_fused(x)

    n_blocks = pl.cdiv(rows, tile_r)
    n_shards = _N_SHARDS if n_blocks >= _N_SHARDS else 1
    steps = pl.cdiv(n_blocks, n_shards)
    need_mask = (n_shards * steps * tile_r) != rows

    # Pass 1: per-shard |x| partial sums.  Shard axis "parallel" (both v7x TensorCores),
    # inner reduction axis "arbitrary" with a resident (8, lane) output block per shard.
    partials = pl.pallas_call(
        _make_abs_sum_kernel(rows, lane, tile_r, steps, need_mask),
        out_shape=jax.ShapeDtypeStruct((n_shards * 8, lane), jnp.float32),
        grid=(n_shards, steps),
        in_specs=[pl.BlockSpec(
            (tile_r, lane),
            lambda s, i: (jnp.minimum(s * steps + i, n_blocks - 1), 0))],
        out_specs=pl.BlockSpec((8, lane), lambda s, i: (s, 0)),
        compiler_params=_cparams(("parallel", "arbitrary")),
    )(x2d)

    # Pass 2: out = (sum(partials) / total) * sign(x).  The partials block stays resident
    # across the grid (constant index), and the division is folded into the kernel.
    out2d = pl.pallas_call(
        _make_scale_sign_kernel(total),
        out_shape=jax.ShapeDtypeStruct((rows, lane), x.dtype),
        grid=(pl.cdiv(rows, tile_r),),
        in_specs=[pl.BlockSpec((n_shards * 8, lane), lambda i: (0, 0)),
                  pl.BlockSpec((tile_r, lane), lambda i: (i, 0))],
        out_specs=pl.BlockSpec((tile_r, lane), lambda i: (i, 0)),
        compiler_params=_cparams(("parallel",)),
    )(partials, x2d)
    return _from_slab(out2d, x.shape, total)


def _binary_layerwise(x):
    # Fused single pass (1 read + 1 write of x) whenever the weight fits comfortably in
    # VMEM; tiled two-pass (2 reads + 1 write) only for larger weights.
    if int(x.size) * 4 <= _FUSED_MAX_BYTES:
        return _binary_layerwise_fused(x)
    return _binary_layerwise_two_pass(x)


# ----------------------------------------------------------------------------
# Binary scheme for 2-D (linear) weights — per-output-row scale.
# TODO(synk): the literal torch expression multiplies a (R,) scale against (R,K) without
# keepdim, which only broadcasts when K == R; we implement the documented intent
# ("output channel-wise scale"), i.e. scale[i] applied to row i.
# ----------------------------------------------------------------------------
def _binary_rowwise_kernel(x_ref, o_ref):
    x = x_ref[...].astype(jnp.float32)
    scale = jnp.mean(jnp.abs(x), axis=1, keepdims=True)
    sgn = jnp.where(x > 0.0, 1.0, jnp.where(x < 0.0, -1.0, 0.0))
    o_ref[...] = (scale * sgn).astype(o_ref.dtype)


def _binary_rowwise(x):
    R, K = x.shape
    sub = _sublane(x.dtype)
    # Adapt row-tile height to K so in+out double buffers stay small on every generation.
    tile_r = max(sub, (_TILE_BYTES // (4 * K)) // sub * sub)
    if R <= tile_r:
        return pl.pallas_call(
            _binary_rowwise_kernel,
            out_shape=jax.ShapeDtypeStruct((R, K), x.dtype),
            compiler_params=_cparams(),
        )(x)
    return pl.pallas_call(
        _binary_rowwise_kernel,
        out_shape=jax.ShapeDtypeStruct((R, K), x.dtype),
        grid=(pl.cdiv(R, tile_r),),
        in_specs=[pl.BlockSpec((tile_r, K), lambda i: (i, 0))],
        out_specs=pl.BlockSpec((tile_r, K), lambda i: (i, 0)),
        compiler_params=_cparams(("parallel",)),
    )(x)


# ----------------------------------------------------------------------------
# The module: WeightQuantizationScheme.forward
# ----------------------------------------------------------------------------
class WeightQuantizationScheme:
    def __init__(self, q_type, threshold=None, bit_width=None, int_bit_width=None):
        if q_type == 'identity':
            self.q_params = QuantizationParams(q_type)
        elif q_type == 'fixed_unsigned':
            self.q_params = UnsignedFixedQuantizationParams(bit_width, int_bit_width, q_type)
        elif q_type == 'fixed_signed':
            self.q_params = SignedFixedQuantizationParams(bit_width, int_bit_width, q_type)
        elif q_type == 'binary':
            self.q_params = QuantizationParams(q_type)
        else:
            raise Exception('Unknown quantization scheme: {}.'.format(q_type))

    def forward(self, x):
        qt = self.q_params.q_type
        if qt == 'identity':
            # Identity.apply(x) == x; returning the input avoids a useless HBM round trip.
            return x
        if qt in ('fixed_signed', 'fixed_unsigned'):
            return _fixed_quant(x, self.q_params)
        if qt == 'binary':
            if x.ndim == 2:
                return _binary_rowwise(x)
            return _binary_layerwise(x)
        raise Exception('Unknown quantization scheme: {}.'.format(qt))

    __call__ = forward

    # TODO(synk): the custom-Function straight-through backward passes (Identity/BinarizeWeight/
    # QuantizeFixedWeight.backward) are autograd rules, not forward compute; not kernelized here.


# ----------------------------------------------------------------------------
# Pure-JAX reference of the torch quantize() formula (for correctness checks).
# ----------------------------------------------------------------------------
def _quantize_ref(x, prescale, postscale, min_val, max_val):
    q = x * prescale
    qr = jnp.round(q)
    qf = jnp.floor(q)
    qc = jnp.ceil(q)
    qi = jnp.trunc(q)
    tmp = jnp.where(q - qi == 0.5, qf, qr)
    tmp = jnp.where(q - qi == -0.5, qc, tmp)
    return jnp.clip(tmp * postscale, min_val, max_val)


if __name__ == "__main__":
    key = jax.random.PRNGKey(0)
    k1, k2, k3 = jax.random.split(key, 3)
    w4 = jax.random.normal(k1, (2, 4, 16, 16), dtype=jnp.float32) * 3.0   # conv-like weight
    w2 = jax.random.normal(k2, (8, 32), dtype=jnp.float32)                # linear-like weight
    w_big = jax.random.normal(k3, (4, 640, 640), dtype=jnp.float32)       # larger conv-like weight

    # ---- fixed_signed: small (single-block path) and larger (tiled, ragged last block) ----
    sch_fs = WeightQuantizationScheme('fixed_signed', bit_width=8, int_bit_width=3)
    p = sch_fs.q_params
    out_fs = sch_fs(w4)
    ref_fs = _quantize_ref(w4, p.prescale, p.postscale, p.min_val, p.max_val)
    assert out_fs.shape == w4.shape and out_fs.dtype == w4.dtype
    assert jnp.allclose(out_fs, ref_fs), "fixed_signed mismatch"

    out_fs_big = sch_fs(w_big)
    ref_fs_big = _quantize_ref(w_big, p.prescale, p.postscale, p.min_val, p.max_val)
    assert jnp.allclose(out_fs_big, ref_fs_big), "fixed_signed (tiled) mismatch"

    # tie handling (exact +/-0.5 after prescale must round toward zero)
    x_tie = jnp.array([0.078125, -0.078125, 0.046875, -0.046875, 0.109375, -0.109375],
                      dtype=jnp.float32)
    out_tie = sch_fs(x_tie)
    ref_tie = _quantize_ref(x_tie, p.prescale, p.postscale, p.min_val, p.max_val)
    assert jnp.allclose(out_tie, ref_tie), "tie-rounding mismatch"

    # ---- fixed_unsigned ----
    sch_fu = WeightQuantizationScheme('fixed_unsigned', bit_width=8, int_bit_width=3)
    pu = sch_fu.q_params
    out_fu = sch_fu(w4)
    ref_fu = _quantize_ref(w4, pu.prescale, pu.postscale, pu.min_val, pu.max_val)
    assert jnp.allclose(out_fu, ref_fu), "fixed_unsigned mismatch"

    # ---- binary, >2-D weight: layer-wise scale (fused single-pass path) ----
    sch_b = WeightQuantizationScheme('binary')
    out_b4 = sch_b(w4)
    ref_b4 = jnp.mean(jnp.abs(w4)) * jnp.sign(w4)
    assert jnp.allclose(out_b4, ref_b4, rtol=1e-5, atol=1e-6), "binary layer-wise mismatch"

    # larger weight through the normal dispatch (fused or two-pass depending on generation)
    ref_b_big = jnp.mean(jnp.abs(w_big)) * jnp.sign(w_big)
    out_b_big = sch_b(w_big)
    assert jnp.allclose(out_b_big, ref_b_big, rtol=1e-4, atol=1e-5), "binary (large) mismatch"

    # explicitly exercise the tiled two-pass sharded-reduction path as well
    out_b_2p = _binary_layerwise_two_pass(w_big)
    assert jnp.allclose(out_b_2p, ref_b_big, rtol=1e-4, atol=1e-5), "binary two-pass mismatch"

    # ---- binary, 2-D weight: per-output-row scale (documented intent) ----
    out_b2 = sch_b(w2)
    ref_b2 = jnp.mean(jnp.abs(w2), axis=1, keepdims=True) * jnp.sign(w2)
    assert jnp.allclose(out_b2, ref_b2, rtol=1e-5, atol=1e-6), "binary row-wise mismatch"

    # ---- identity ----
    sch_id = WeightQuantizationScheme('identity')
    out_id = sch_id(w4)
    assert jnp.allclose(out_id, w4)

    jax.block_until_ready((out_fs, out_fs_big, out_tie, out_fu,
                           out_b4, out_b_big, out_b_2p, out_b2, out_id))
    print("KERNEL_OK")
</pallas_src>

<mosaic_0001>
module attributes {stable_mosaic.version = 11 : i64} {
  func.func @kernel(%arg0: memref<2x1024xf32, #tpu.memory_space<vmem>>, %arg1: memref<2x1024xf32, #tpu.memory_space<vmem>>) attributes {dimension_semantics = [], scalar_prefetch = 0 : i64, scratch_operands = 0 : i64, tpu.core_type = #tpu.core_type<tc>} {
    %c0 = arith.constant 0 : index
    %c0_0 = arith.constant 0 : index
    %0 = vector.load %arg0[%c0, %c0_0] : memref<2x1024xf32, #tpu.memory_space<vmem>>, vector<2x1024xf32>
    %cst = arith.constant 3.200000e+01 : f32
    %1 = vector.broadcast %cst : f32 to vector<2x1024xf32>
    %2 = arith.mulf %0, %1 : vector<2x1024xf32>
    %cst_1 = arith.constant 0.000000e+00 : f32
    %3 = vector.broadcast %cst_1 : f32 to vector<2x1024xf32>
    %4 = arith.cmpf oge, %2, %3 : vector<2x1024xf32>
    %cst_2 = arith.constant 5.000000e-01 : f32
    %5 = vector.broadcast %cst_2 : f32 to vector<2x1024xf32>
    %6 = arith.subf %2, %5 : vector<2x1024xf32>
    %7 = math.ceil %6 : vector<2x1024xf32>
    %cst_3 = arith.constant 5.000000e-01 : f32
    %8 = vector.broadcast %cst_3 : f32 to vector<2x1024xf32>
    %9 = arith.addf %2, %8 : vector<2x1024xf32>
    %10 = math.floor %9 : vector<2x1024xf32>
    %11 = arith.select %4, %7, %10 : vector<2x1024xi1>, vector<2x1024xf32>
    %cst_4 = arith.constant 3.125000e-02 : f32
    %12 = vector.broadcast %cst_4 : f32 to vector<2x1024xf32>
    %13 = arith.mulf %11, %12 : vector<2x1024xf32>
    %cst_5 = arith.constant -4.000000e+00 : f32
    %cst_6 = arith.constant 3.968750e+00 : f32
    %14 = vector.broadcast %cst_5 : f32 to vector<2x1024xf32>
    %15 = arith.maximumf %14, %13 : vector<2x1024xf32>
    %16 = vector.broadcast %cst_6 : f32 to vector<2x1024xf32>
    %17 = arith.minimumf %16, %15 : vector<2x1024xf32>
    %c0_7 = arith.constant 0 : index
    %c0_8 = arith.constant 0 : index
    %18 = vector.load %arg1[%c0_7, %c0_8] : memref<2x1024xf32, #tpu.memory_space<vmem>>, vector<2x1024xf32>
    tpu.vector_store %arg1[%c0_7, %c0_8], %17 {strides = array<i32>} : memref<2x1024xf32, #tpu.memory_space<vmem>>, vector<2x1024xf32>,
    return
  }
}

</mosaic_0001>

<bundles_post_ra>
// kernel: tpu_custom_call.1
= control target key start
LH: loop header
LB: loop body
LE: loop exit
PB: predicated region body
PF: predicated region fallthrough
CT: control target
= control target key end

     0   :  { %6 = vsyncpa [#allocation3], 0  ;;  %s126_s0 = inlined_call_operand.hbm [shape: f32[2,1024], index: 0, kind: input, shape index: {}]   ;;  %s127_s1 = inlined_call_operand.hbm [shape: f32[2,1024], index: 1, kind: output, shape index: {}]  }
   0x1   :  { %7 = vsyncpa [#allocation4], 0  ;;  %s108_s6 = smov [#allocation2]  }
   0x2   :  { %s14_s7 = sshll.u32 %s108_s6, 4  ;;  %s15_s7 = int_to_ptr.vmem [resolvable:$true] %s14_s7 }
   0x3   :  { %s72_s8 = scalar_lea.vmem %s15_s7, 256  ;;  %p77_p1 = scmp.lt.s32.totalorder %s15_s7, %s15_s7 }
   0x4   :  { %p73_p0 = scmp.ne.s32.totalorder %s15_s7, %s72_s8  ;;  %p78_p2 = scmp.lt.s32.totalorder %s72_s8, %s72_s8 }
   0x6   :  { %p79_p3 = por %p78_p2, %p77_p1 }
   0x8   :  { %p80_p4 = pnand %p79_p3, %p73_p0 }
   0xa   :  { %83 = shalt.err (!%p80_p4)
}
   0xb   :  { %17 = dma.hbm_to_vmem [thread:$0]  %s126_s0, 256, %s15_s7, [#allocation3]  }
   0xc   :  { %104 = dma.done.wait [#allocation3], 256  }
   0xd   :  { %105 = vsyncadd [#allocation3], 4294967040  ;;  %v21_v0 = vld [vmem:[#allocation2] sm:$0xff]  ;;  %v22_v1 = vld [vmem:[#allocation2 + $0x8] sm:$0xff]  ;;  %s109_s0 = smov [#allocation5]  }
   0xe   :  { %v23_v2 = vmul.f32 32.0, %v21_v0  ;;  %v24_v3 = vmul.f32 32.0, %v22_v1  ;;  %s51_s11 = sshll.u32 %s109_s0, 4  ;;  %s52_s11 = int_to_ptr.vmem [resolvable:$true] %s51_s11 }
   0xf   :  { %s84_s12 = scalar_lea.vmem %s52_s11, 256  ;;  %p89_p6 = scmp.lt.s32.totalorder %s52_s11, %s52_s11 }
  0x10   :  { %v60_v4 = vadd.f32 -0.5, %v23_v2  ;;  %v31_v5 = vadd.f32 0.5, %v23_v2  ;;  %vm25_vm0 = vcmp.ge.f32.partialorder %v23_v2, 0.0  ;;  %v61_v6 = vadd.f32 -0.5, %v24_v3  ;;  %p85_p5 = scmp.ne.s32.totalorder %s52_s11, %s84_s12  ;;  %p90_p7 = scmp.lt.s32.totalorder %s84_s12, %s84_s12 }
  0x11   :  { %v32_v7 = vadd.f32 0.5, %v24_v3  ;;  %vm26_vm1 = vcmp.ge.f32.partialorder %v24_v3, 0.0 }
  0x12   :  { %v29_v8 = vceil.f32 %v60_v4  ;;  %v33_v9 = vfloor.f32 %v31_v5  ;;  %v30_v10 = vceil.f32 %v61_v6  ;;  %p91_p8 = por %p90_p7, %p89_p6 }
  0x13   :  { %v34_v11 = vfloor.f32 %v32_v7 }
  0x14   :  { %v35_v12 = vsel %vm25_vm0, %v29_v8, %v33_v9  ;;  %p92_p9 = pnand %p91_p8, %p85_p5 }
  0x15   :  { %v37_v13 = vmul.f32 0.03125, %v35_v12  ;;  %v36_v14 = vsel %vm26_vm1, %v30_v10, %v34_v11 }
  0x16   :  { %v38_v15 = vmul.f32 0.03125, %v36_v14 }
  0x17   :  { %v39_v16 = vmax.f32 %v37_v13, -4.0 }
  0x18   :  { %v40_v17 = vmax.f32 %v38_v15, -4.0 }
  0x19   :  { %v41_v18 = vmin.f32 %v39_v16, 3.96875 }
  0x1a   :  { %v42_v19 = vmin.f32 %v40_v17, 3.96875 }
  0x1b   :  { %43 = vst [vmem:[#allocation5] sm:$0xff] %v41_v18 }
  0x1c   :  { %44 = vst [vmem:[#allocation5 + $0x8] sm:$0xff] %v42_v19 }
  0x1d   :  { %95 = shalt.err (!%p92_p9)
}
  0x1e   :  { %54 = dma.vmem_to_hbm [thread:$0]  %s52_s11, 256, %s127_s1, [#allocation4]  }
  0x1f   :  { %106 = dma.done.wait [#allocation4], 256  }
  0x20   :  { %107 = vsyncadd [#allocation4], 4294967040 }
  0x21   :  { %58 = vsyncpa [#allocation3], 1 }
  0x22   :  { %59 = vsyncpa [#allocation4], 1 }

</bundles_post_ra>
